<compile_context>
chip_gen: v7x
topology: tpu7x:2x2x1
jax: 0.10.0
libtpu: 0.0.40
codegen_flags: <defaults>
</compile_context>

<pallas_src>
import jax
import jax.numpy as jnp
import numpy as np
from jax.experimental import pallas as pl
from jax.experimental.pallas import tpu as pltpu


def _round_up(v, m):
    return ((v + m - 1) // m) * m


def _td_conv1d_kernel(x_ref, w_ref, b_ref, o_ref):
    """One MXU matmul per row tile.

    x_ref: (TN, F)      -- TN rows of the flattened (B*T, F) input
    w_ref: (F, P)       -- banded im2col weight, P = round_up(Cout*Lout, 128)
    b_ref: (1, P)       -- bias repeated per output column (zero in padding)
    o_ref: (TN, P)      -- lane-dense output tile
    """
    acc = jnp.dot(x_ref[...], w_ref[...], preferred_element_type=jnp.float32)
    o_ref[...] = (acc + b_ref[...]).astype(o_ref.dtype)


def _build_banded_weight(weight, bias, f_dim, p):
    """Build W' (F, P) with W'[f, c*Lout + l] = weight[c, 0, f - l] (0 elsewhere)
    and the matching per-column bias row (1, P)."""
    cout, _, k = weight.shape
    lout = f_dim - k + 1
    w2d = weight.reshape(cout, k).astype(jnp.float32)

    f_idx = jnp.arange(f_dim)[:, None]                      # (F, 1)
    l_idx = jnp.arange(lout)[None, :]                       # (1, Lout)
    tap = f_idx - l_idx                                     # (F, Lout)
    valid = (tap >= 0) & (tap < k)
    tap_c = jnp.clip(tap, 0, k - 1)
    w_gath = w2d[:, tap_c]                                  # (Cout, F, Lout)
    w_band = jnp.where(valid[None, :, :], w_gath, 0.0)      # (Cout, F, Lout)
    wp = jnp.transpose(w_band, (1, 0, 2)).reshape(f_dim, cout * lout)
    wp = jnp.pad(wp, ((0, 0), (0, p - cout * lout)))        # (F, P)

    bp = jnp.repeat(bias.astype(jnp.float32), lout)         # (Cout*Lout,)
    bp = jnp.pad(bp, (0, p - cout * lout)).reshape(1, p)    # (1, P)
    return wp, bp


def time_distributed_conv1d(x, weight, bias, *, batch_first=True, row_tile=512):
    """Pallas implementation of TimeDistibuted(nn.Conv1d(1, Cout, K))(x).

    x:      (B, T, F) float32 (batch_first layout)
    weight: (Cout, 1, K)
    bias:   (Cout,)
    returns (B, T*Cout, Lout) with Lout = F - K + 1 (batch_first branch).
    """
    if x.ndim <= 2:
        # TODO(synk): <=2D passthrough delegates to the wrapped module; a 2D
        # tensor is not a valid NCL Conv1d input, so this branch is unused here.
        raise NotImplementedError("<=2D passthrough not supported for Conv1d")

    b_dim, t_dim, f_dim = x.shape
    cout, cin, k = weight.shape
    assert cin == 1, "TimeDistributed reshape implies a single conv input channel"
    lout = f_dim - k + 1
    n = b_dim * t_dim

    # Lane-dense output width (multiple of 128) -> unmasked vector stores.
    p = _round_up(cout * lout, 128)
    wp, bp = _build_banded_weight(weight, bias, f_dim, p)

    # Row tiling: large tiles to amortize per-grid-step overhead, but keep at
    # least 2 grid steps when N allows so v7x's 2 TensorCores both get work.
    # VMEM/step ~= 2*(tile*F*4) + 2*(tile*P*4) double-buffered; with the default
    # 512-row tile this stays far below v7x's 32 MiB scoped-VMEM default.
    eff_tile = min(int(row_tile), max(8, _round_up(pl.cdiv(n, 2), 8)))
    eff_tile = max(8, eff_tile)
    n_pad = _round_up(n, eff_tile)
    grid = (n_pad // eff_tile,)

    x2d = x.reshape(n, f_dim)                               # == view(-1, 1, F), C squeezed
    if n_pad != n:
        x2d = jnp.pad(x2d, ((0, n_pad - n), (0, 0)))

    y_pad = pl.pallas_call(
        _td_conv1d_kernel,
        out_shape=jax.ShapeDtypeStruct((n_pad, p), x.dtype),
        grid=grid,
        in_specs=[
            pl.BlockSpec((eff_tile, f_dim), lambda i: (i, 0)),
            pl.BlockSpec((f_dim, p), lambda i: (0, 0)),      # resident, constant index
            pl.BlockSpec((1, p), lambda i: (0, 0)),
        ],
        out_specs=pl.BlockSpec((eff_tile, p), lambda i: (i, 0)),
        compiler_params=pltpu.CompilerParams(
            dimension_semantics=("parallel",)),
    )(x2d, wp, bp)                                           # (n_pad, P)

    y = y_pad[:n, :cout * lout].reshape(n, cout, lout)       # (N, Cout, Lout)

    if batch_first:
        return y.reshape(b_dim, -1, lout)                    # (B, T*Cout, Lout)
    else:
        # Matches PyTorch's y.view(-1, x.size(1), y.size(-1)) on a contiguous
        # (N, Cout, Lout) tensor; only meaningful if x was (T, B, F) to begin with.
        return y.reshape(-1, t_dim, lout)


def _reference(x, weight, bias):
    """Plain-JAX reference matching the PyTorch forward exactly."""
    b_dim, t_dim, f_dim = x.shape
    cout, _, k = weight.shape
    lout = f_dim - k + 1
    x2d = x.reshape(b_dim * t_dim, f_dim)
    cols = jnp.stack([x2d[:, kk:kk + lout] for kk in range(k)], axis=-1)  # (N,Lout,K)
    y = jnp.einsum("nlk,ck->ncl", cols, weight[:, 0, :]) + bias[None, :, None]
    return y.reshape(b_dim, -1, lout)


if __name__ == "__main__":
    # Small deterministic shapes: batch=2, seq(time)=8, feature=16.
    B, T, F = 2, 8, 16
    COUT, K = 4, 3

    key = jax.random.PRNGKey(0)
    kx, kw, kb = jax.random.split(key, 3)

    x = jax.random.normal(kx, (B, T, F), dtype=jnp.float32)

    # Deterministic Conv1d(1, COUT, K) init (PyTorch-style uniform +-1/sqrt(fan_in)).
    fan_in = 1 * K
    bound = 1.0 / np.sqrt(fan_in)
    weight = jax.random.uniform(kw, (COUT, 1, K), jnp.float32, -bound, bound)
    bias = jax.random.uniform(kb, (COUT,), jnp.float32, -bound, bound)

    y = time_distributed_conv1d(x, weight, bias, batch_first=True)
    y = jax.block_until_ready(y)

    y_ref = _reference(x, weight, bias)
    assert y.shape == (B, T * COUT, F - K + 1), y.shape
    np.testing.assert_allclose(np.asarray(y), np.asarray(y_ref), rtol=1e-5, atol=1e-5)

    print("KERNEL_OK")
</pallas_src>

<mosaic_0001>
module attributes {stable_mosaic.version = 11 : i64} {
  func.func @_td_conv1d_kernel(%arg0: i32, %arg1: memref<8x16xf32, #tpu.memory_space<vmem>>, %arg2: memref<16x128xf32, #tpu.memory_space<vmem>>, %arg3: memref<1x128xf32, #tpu.memory_space<vmem>>, %arg4: memref<8x128xf32, #tpu.memory_space<vmem>>) attributes {dimension_semantics = [#tpu.dimension_semantics<parallel>], iteration_bounds = array<i64: 2>, scalar_prefetch = 0 : i64, scratch_operands = 0 : i64, tpu.core_type = #tpu.core_type<tc>, window_params = [{transform_indices = @transform_0, window_bounds = array<i64: 8, 16>}, {pipeline_mode = #tpu.pipeline_mode<synchronous>, transform_indices = @transform_1, window_bounds = array<i64: 16, 128>}, {pipeline_mode = #tpu.pipeline_mode<synchronous>, transform_indices = @transform_2, window_bounds = array<i64: 1, 128>}, {transform_indices = @transform_3, window_bounds = array<i64: 8, 128>}]} {
    %c0 = arith.constant 0 : index
    %c0_0 = arith.constant 0 : index
    %0 = vector.load %arg1[%c0, %c0_0] : memref<8x16xf32, #tpu.memory_space<vmem>>, vector<8x16xf32>
    %c0_1 = arith.constant 0 : index
    %c0_2 = arith.constant 0 : index
    %1 = vector.load %arg2[%c0_1, %c0_2] : memref<16x128xf32, #tpu.memory_space<vmem>>, vector<16x128xf32>
    %cst = arith.constant dense<0.000000e+00> : vector<8x128xf32>
    %2 = tpu.matmul %0, %1, %cst {dimension_numbers = #tpu.dot_dimension_numbers<[1], [0], [0], [1], [0, 0, 1, 1], [], []>} : vector<8x16xf32>, vector<16x128xf32>, vector<8x128xf32> -> vector<8x128xf32>
    %c0_3 = arith.constant 0 : index
    %c0_4 = arith.constant 0 : index
    %3 = vector.load %arg3[%c0_3, %c0_4] : memref<1x128xf32, #tpu.memory_space<vmem>>, vector<1x128xf32>
    %4 = vector.broadcast %3 : vector<1x128xf32> to vector<8x128xf32>
    %5 = arith.addf %2, %4 : vector<8x128xf32>
    %c0_5 = arith.constant 0 : index
    %c0_6 = arith.constant 0 : index
    %6 = vector.load %arg4[%c0_5, %c0_6] : memref<8x128xf32, #tpu.memory_space<vmem>>, vector<8x128xf32>
    tpu.vector_store %arg4[%c0_5, %c0_6], %5 {strides = array<i32>} : memref<8x128xf32, #tpu.memory_space<vmem>>, vector<8x128xf32>,
    return
  }
  func.func @transform_0(%arg0: i32) -> (i32, i32) {
    %c0_i32 = arith.constant 0 : i32
    %c0_i32_0 = arith.constant 0 : i32
    return %arg0, %c0_i32 : i32, i32
  }
  func.func @transform_1(%arg0: i32) -> (i32, i32) {
    %c0_i32 = arith.constant 0 : i32
    %c0_i32_0 = arith.constant 0 : i32
    %c0_i32_1 = arith.constant 0 : i32
    return %c0_i32, %c0_i32_0 : i32, i32
  }
  func.func @transform_2(%arg0: i32) -> (i32, i32) {
    %c0_i32 = arith.constant 0 : i32
    %c0_i32_0 = arith.constant 0 : i32
    %c0_i32_1 = arith.constant 0 : i32
    return %c0_i32, %c0_i32_0 : i32, i32
  }
  func.func @transform_3(%arg0: i32) -> (i32, i32) {
    %c0_i32 = arith.constant 0 : i32
    %c0_i32_0 = arith.constant 0 : i32
    return %arg0, %c0_i32 : i32, i32
  }
}

</mosaic_0001>

<bundles_post_ra>
// kernel: tpu_custom_call.1
= control target key start
LH: loop header
LB: loop body
LE: loop exit
PB: predicated region body
PF: predicated region fallthrough
CT: control target
= control target key end

     0   :  { %8 = vsyncpa [#allocation3], 0  ;;  %s828_s0 = inlined_call_operand.hbm [shape: f32[16,16], index: 0, kind: input, shape index: {}]   ;;  %s829_s1 = inlined_call_operand.hbm [shape: f32[16,128], index: 1, kind: input, shape index: {}]   ;;  %s830_s2 = inlined_call_operand.vmem [shape: f32[1,128], index: 2, kind: input, shape index: {}]   ;;  %s831_s3 = inlined_call_operand.hbm [shape: f32[16,128], index: 3, kind: output, shape index: {}]  }
   0x1   :  { %10 = vsyncpa [#allocation3 + $0x1], 0 }
   0x2   :  { %11 = vsyncpa [#allocation6], 0 }
   0x3   :  { %12 = vsyncpa [#allocation4], 0 }
   0x4   :  { %14 = vsyncpa [#allocation4 + $0x1], 0  ;;  %s629_s12 = smov 0   ;;  %s631_s13 = smov 0  }
   0x5   :  { %s633_s14 = smov 0   ;;  %s635_s15 = smov 0  }
   0x6 LB: > { %s650_s16 = sadd.s32 4294967295, %s599_s15   ;;  %s380_s17 = sadd.s32 4294967294, %s599_s15   ;;  %s599_s15 = sphi %s635_s15, %s851_s15   ;;  %s595_s14 = sphi %s633_s14, %s850_s14   ;;  %s591_s13 = sphi %s631_s13, %s849_s13   ;;  %s587_s12 = sphi %s629_s12, %s848_s12  }
   0x7   : > { %p40_p0 = scmp.ne.s32.totalorder %s591_s13, %s587_s12  ;;  %p832_p1 = scmp.eq.s32.totalorder %s650_s16, 0 }
   0x8   : > { %p112_p3 = scmp.eq.s32.totalorder %s380_s17, 1  ;;  %p381_p5 = scmp.ge.s32.totalorder %s599_s15, 1 }
   0x9   : > { %p659_p4 = por %p832_p1, %p40_p0  ;;  %p119_p7 = scmp.lt.s32.totalorder %s599_s15, 3 }
   0xa   : > { %p664_p6 = por %p112_p3, %p40_p0  ;;  %s601_s21 = smov [#allocation5]  }
   0xb   : > { %s835_s18 = scalar_select %p659_p4, 1, 0 }
   0xc   : > { %s836_s19 = scalar_select %p664_p6, 1, 0 }
   0xd   : > { %p669_p8 = pnand %p381_p5, %p119_p7  ;;  %s131_s22 = sshll.u32 %s601_s21, 4  ;;  %s673_s22 = int_to_ptr.vmem [resolvable:$true] %s131_s22 }
   0xe   : > { %s685_s24 = sadd.s32 1, %s599_s15   ;;  %s27_s25 = sadd.s32 1, %s595_s14 }
   0xf   : > { %s837_s20 = scalar_select %p669_p8, 1, 0 }
  0x10   : > { %p417_p9 = pneg %p669_p8  ;;  %s24_s26 = ssub.s32 %s599_s15, %s685_s24 }
  0x11   : > { %s471_s29 = scalar_lea.hbm %s829_s1, 256 }
  0x12   : > { %p680_p11 = pnand %p417_p9, %p832_p1  ;;  %p472_p12 = scmp.ne.s32.totalorder %s829_s1, %s471_s29 }
  0x13   : > { %p478_p5 = scmp.lt.u32.totalorder %s471_s29, %s829_s1 }
  0x14   : > { %p473_p13 = pneg %p680_p11 }
  0x16   : > { %p474_p0 = pnand %p473_p13, %p472_p12 }
  0x18   : > { %p475_p3 = pneg %p474_p0 }
  0x1a   : > { %p480_p7 = pnand %p478_p5, %p475_p3 }
  0x1c   : > { %483 = shalt.err (!%p480_p7)
}
  0x1d   : > { %s484_s7 = scalar_lea.vmem %s673_s22, 256  ;;  %p492_p2 = scmp.lt.s32.totalorder %s673_s22, %s673_s22 }
  0x1e   : > { %p485_p9 = scmp.ne.s32.totalorder %s673_s22, %s484_s7  ;;  %p493_p6 = scmp.lt.s32.totalorder %s484_s7, %s484_s7 }
  0x20   : > { %p487_p10 = pnand %p485_p9, %p473_p13  ;;  %p494_p4 = por %p493_p6, %p492_p2 }
  0x22   : > { %p488_p1 = pneg %p487_p10 }
  0x24   : > { %p495_p8 = pnand %p494_p4, %p488_p1 }
  0x26   : > { %498 = shalt.err (!%p495_p8)
}
  0x27   : > { %s602_s8 = smov 128   ;;  %s603_s9 = smov 8  }
  0x28   : > { %420 = dma.hbm_to_vmem [thread:$0]  (!%p680_p11), %s829_s1, 256, %s673_s22, [#allocation6], %s602_s8, %s602_s8, %s603_s9  }
  0x29   : > { %p25_p2 = scmp.eq.s32.totalorder %s24_s26, 0  ;;  %p34_p1 = scmp.ne.s32.totalorder %s595_s14, %s591_s13 }
  0x2a   : > { %p35_p4 = scmp.eq.s32.totalorder %s599_s15, 0  ;;  %p430_p6 = scmp.lt.s32.totalorder %s599_s15, 2 }
  0x2b   : > { %s716_s17 = scalar_select %p25_p2, %s595_s14, %s27_s25  }
  0x2c   : > { %p36_p8 = por %p35_p4, %p34_p1  ;;  %p839_p10 = scmp.eq.s32.totalorder %s650_s16, 1 }
  0x2d   : > { %s148_s27 = sand.u32 1, %s595_s14   ;;  %s385_s28 = sshll.u32 %s599_s15, 7 }
  0x2e   : > { %p720_p12 = por %p839_p10, %p34_p1  ;;  %s384_s29 = sshll.u32 %s148_s27, 3 }
  0x2f   : > { %s729_s4 = scalar_lea.hbm %s828_s0, %s385_s28  ;;  %s152_s22 = scalar_lea.vmem [#allocation2], %s384_s29 }
  0x30   : > { %s159_s25 = sshll.u32 %s152_s22, 4  ;;  %p731_p11 = pnand %p430_p6, %p36_p8  ;;  %s735_s25 = int_to_ptr.vmem [resolvable:$true] %s159_s25 }
  0x31   : > { %s149_s5 = scalar_lea.sflag [#allocation3], %s148_s27  ;;  %s499_s6 = scalar_lea.hbm %s729_s4, 128 }
  0x32   : > { %p500_p13 = scmp.ne.s32.totalorder %s729_s4, %s499_s6  ;;  %p501_p0 = pneg %p731_p11 }
  0x33   : > { %s504_s9 = scalar_lea.hbm %s828_s0, 256  ;;  %p505_p7 = scmp.lt.u32.totalorder %s729_s4, %s828_s0 }
  0x34   : > { %p502_p3 = pnand %p501_p0, %p500_p13  ;;  %p506_p9 = scmp.lt.u32.totalorder %s504_s9, %s499_s6 }
  0x35   : > { %p508_p1 = scmp.lt.u32.totalorder %s499_s6, %s729_s4 }
  0x36   : > { %p503_p5 = pneg %p502_p3  ;;  %p507_p2 = por %p506_p9, %p505_p7 }
  0x38   : > { %p509_p4 = por %p508_p1, %p507_p2 }
  0x3a   : > { %p510_p6 = pnand %p509_p4, %p503_p5 }
  0x3c   : > { %513 = shalt.err (!%p510_p6)
}
  0x3d   : > { %s514_s27 = scalar_lea.vmem %s735_s25, 128  ;;  %s604_s28 = smov [#allocation2]  }
  0x3e   : > { %p515_p8 = scmp.ne.s32.totalorder %s735_s25, %s514_s27  ;;  %s519_s29 = sshll.u32 %s604_s28, 4  ;;  %s520_s29 = int_to_ptr.vmem [resolvable:$false] %s519_s29 }
  0x3f   : > { %s521_s23 = scalar_lea.vmem %s520_s29, 256  ;;  %p522_p3 = scmp.lt.s32.totalorder %s735_s25, %s520_s29 }
  0x40   : > { %p517_p10 = pnand %p515_p8, %p501_p0  ;;  %p523_p7 = scmp.lt.s32.totalorder %s521_s23, %s514_s27 }
  0x42   : > { %p518_p13 = pneg %p517_p10  ;;  %p524_p9 = por %p523_p7, %p522_p3 }
  0x44   : > { %p525_p2 = pnand %p524_p9, %p518_p13 }
  0x46   : > { %528 = shalt.err (!%p525_p2)
}
  0x47   : > { %424 = dma.hbm_to_vmem [thread:$0]  (!%p731_p11), %s729_s4, 128, %s735_s25, %s149_s5  }
  0x48   : > { %p842_p5 = scmp.ne.s32.totalorder %s837_s20, 0 }
  0x49   : > { %s765_s30 = sand.u32 (!%p842_p5), 1, %s591_s13   ;;  %p843_p0 = scmp.ne.s32.totalorder (!%p842_p5), %s835_s18, 0 }
  0x4a   : > { %168 = sbr.rel (%p842_p5) target bundleno = 319 (0x13f), region = 32  ;;  %s387_s22 = sshll.u32 (!%p842_p5), %s765_s30, 3 }
  0x4b   : > { %s171_s6 = scalar_lea.sflag (!%p842_p5), [#allocation3], %s765_s30  ;;  %s174_s7 = scalar_lea.vmem (!%p842_p5), [#allocation2], %s387_s22 }
  0x51   : > { %574 = dma.done.wait (%p843_p0), %s171_s6, 128  }
  0x52   : > { %576 = vsyncadd (%p843_p0), %s171_s6, 4294967168  ;;  %p844_p1 = scmp.eq.s32.totalorder %s650_s16, 0 }
  0x54   : > { %578 = dma.done.wait (%p844_p1), [#allocation6], 256   ;;  %p845_p11 = pmov %p844_p1 }
  0x55   : > { %v605_v0 = vmov 0.0|0.0   ;;  %vm606_vm0 = vmmov 0   ;;  %v607_v1 = vmov 0.0   ;;  %v202_v2 = vld [vmem:[#allocation5] sm:$0xff]  ;;  %v203_v3 = vld [vmem:[#allocation5 + $0x8] sm:$0xff]  ;;  %v201_v5 = vld [vmem:[%s174_s7] sm:$0xff] }
  0x56   : > { %580 = vsyncadd (%p845_p11), [#allocation6], 4294967040  ;;  %406 = vmatprep.subr.bf16.mxu0 %v605_v0  ;;  %403 = vmatprep.mubr.msk.f32.mxu0 %vm606_vm0, %v607_v1  ;;  %v407_v4 = vpack.c.bf16 %v203_v3, %v202_v2  ;;  %vm211_vm1 = vcmask 130048   ;;  %v390_v6 = vld [vmem:[%s830_s2] ss:$0 sm:$0xff]  ;;  %s393_s4 = sshll.u32 %s650_s16, 7 }
  0x57   : > { %s200_s25 = scalar_lea.vmem [#allocation7], %s387_s22  ;;  %s784_s9 = scalar_lea.hbm %s831_s3, %s393_s4 }
  0x58   : > { %408 = vmatpush3.bf16.msra.mxu0 %v407_v4  ;;  %s300_s26 = sshll.u32 %s200_s25, 4  ;;  %s287_s10 = scalar_lea.sflag [#allocation4], %s765_s30  ;;  %s786_s26 = int_to_ptr.vmem [resolvable:$true] %s300_s26 }
  0x59   : > { %s529_s11 = scalar_lea.vmem %s786_s26, 128  ;;  %s608_s16 = smov [#allocation7]  }
  0x5a   : > { %p530_p4 = scmp.ne.s32.totalorder %s786_s26, %s529_s11  ;;  %s533_s27 = sshll.u32 %s608_s16, 4  ;;  %s534_s27 = int_to_ptr.vmem [resolvable:$false] %s533_s27 }
  0x5b   : > { %404 = vmatmul.mubr.msk.f32.vlgmr.msra.gmra.mrb[0].mxu0 %vm211_vm1, %v201_v5  ;;  %s535_s28 = scalar_lea.vmem %s534_s27, 256  ;;  %p536_p10 = scmp.lt.s32.totalorder %s786_s26, %s534_s27 }
  0x5c   : > { %p531_p6 = pnand %p530_p4, %p720_p12  ;;  %p537_p13 = scmp.lt.s32.totalorder %s535_s28, %s529_s11 }
  0x5e   : > { %p532_p8 = pneg %p531_p6  ;;  %p538_p3 = por %p537_p13, %p536_p10 }
  0x60   : > { %p539_p7 = pnand %p538_p3, %p532_p8 }
 0x12e   : > { %v281_v7 = vpop.f32.mrb[0].mxu0 }
 0x12f   : > { %v282_v8 = vadd.f32 %v390_v6, %v281_v7  ;;  %v405_v9 = vpop.f32.mrb[1].mxu0 }
 0x131   : > { %285 = vst [vmem:[%s200_s25] sm:$0xff] %v282_v8 }
 0x132   : > { %542 = shalt.err (!%p539_p7)
}
 0x133   : > { %s543_s29 = scalar_lea.hbm %s784_s9, 128  ;;  %s547_s22 = scalar_lea.hbm %s831_s3, 256 }
 0x134   : > { %p544_p9 = scmp.ne.s32.totalorder %s784_s9, %s543_s29  ;;  %p548_p0 = scmp.lt.u32.totalorder %s784_s9, %s831_s3 }
 0x135   : > { %p549_p1 = scmp.lt.u32.totalorder %s547_s22, %s543_s29  ;;  %p551_p4 = scmp.lt.u32.totalorder %s543_s29, %s784_s9 }
 0x136   : > { %p545_p2 = pnand %p544_p9, %p720_p12 }
 0x137   : > { %p550_p11 = por %p549_p1, %p548_p0 }
 0x138   : > { %p546_p5 = pneg %p545_p2 }
 0x139   : > { %p552_p6 = por %p551_p4, %p550_p11 }
 0x13b   : > { %p553_p8 = pnand %p552_p6, %p546_p5 }
 0x13d   : > { %556 = shalt.err (!%p553_p8)
}
 0x13e   : > { %415 = dma.vmem_to_hbm [thread:$0]  (%p720_p12), %s786_s26, 128, %s784_s9, %s287_s10  }
 0x13f PF: > { %s312_s18 = sand.u32 1, %s587_s12   ;;  %p846_p10 = scmp.ne.s32.totalorder %s836_s19, 0 }
 0x140   : > { %p847_p13 = scmp.ge.s32.totalorder %s599_s15, 2  ;;  %s313_s20 = scalar_lea.sflag [#allocation4], %s312_s18 }
 0x142   : > { %p426_p3 = pnand %p847_p13, %p846_p10 }
 0x144   : > { %582 = dma.done.wait (!%p426_p3), %s313_s20, 128  }
 0x145   : > { %584 = vsyncadd (!%p426_p3), %s313_s20, 4294967168  ;;  %p17_p7 = scmp.ge.s32.totalorder %s685_s24, 4   ;;  %s848_s12 = smov %s591_s13 }
 0x146   : > { %s849_s13 = smov %s595_s14  ;;  %s850_s14 = smov %s716_s17 }
 0x147   : > { %s851_s15 = smov %s685_s24  ;;  %19 = sbr.rel (!%p17_p7) target bundleno = 6 (0x6), region = 81 }
 0x14e   :  { %318 = vsyncpa [#allocation3], 1 }
 0x14f   :  { %320 = vsyncpa [#allocation3 + $0x1], 1 }
 0x150   :  { %321 = vsyncpa [#allocation6], 1 }
 0x151   :  { %322 = vsyncpa [#allocation4], 1 }
 0x152   :  { %324 = vsyncpa [#allocation4 + $0x1], 1 }

</bundles_post_ra>
